<compile_context>
chip_gen: v6e
topology: v6e:2x2x1
jax: 0.10.0
libtpu: 0.0.40
codegen_flags: <defaults>
</compile_context>

<pallas_src>
import math
import numpy as np

import jax
import jax.numpy as jnp
from jax.experimental import pallas as pl
from jax.experimental.pallas import tpu as pltpu


# ------------------------------- helpers ------------------------------------

def _round_up(n, m):
    return ((n + m - 1) // m) * m


def _pad_last(a, target):
    pad = target - a.shape[-1]
    if pad == 0:
        return a
    widths = [(0, 0)] * (a.ndim - 1) + [(0, pad)]
    return jnp.pad(a, widths)


def _vmem_budget_bytes():
    """~Half of physical per-core VMEM, capped at 64 MiB (v7x -> 32 MiB)."""
    try:
        cap = int(pltpu.get_tpu_info().vmem_capacity_bytes)
    except Exception:
        return 32 * 1024 * 1024          # conservative, works on all gens
    return min(max(cap // 2, 16 * 1024 * 1024), 64 * 1024 * 1024)


def _pick_batch_tile(batch, seq_len, target_rows, max_rows):
    """Largest divisor of `batch` whose row-slab (Bt*S) is MXU-friendly,
    leaving >=2 grid steps (v7x megacore) and keeping block shapes legal."""
    if seq_len % 8 != 0:
        # Bt*S would not be sublane-aligned for Bt < B; use one full block.
        return batch
    cap = batch // 2 if batch >= 2 else batch   # keep >=2 grid steps
    cap = max(cap, 1)
    best = 1
    for bt in range(1, cap + 1):
        if batch % bt:
            continue
        if bt * seq_len > max_rows:
            break
        best = bt
        if bt * seq_len >= target_rows:
            break
    return best


# ----------------------------- Pallas kernel --------------------------------

def make_kernel(active_shifts, batch_tile, seq_len, c_real_out):
    """Fused kernel for a fixed architecture (statically unrolled).

    active_shifts: per-layer tuple of causal left-shifts (taps with
    shift >= S already dropped host-side, matching the fused weight layout).
    """
    S = seq_len
    Bt = batch_tile
    R = Bt * S
    num_layers = len(active_shifts)

    def kernel(*refs):
        x_ref, wp_ref, pe_ref = refs[:3]
        conv_refs = refs[3:3 + 2 * num_layers]
        gamma_ref, beta_ref, out_ref = refs[3 + 2 * num_layers:]

        # ---- input projection (bf16 MXU, f32 accumulation) ----
        x = x_ref[...].astype(jnp.bfloat16)                      # (R, Din)
        h = jnp.dot(x, wp_ref[...], preferred_element_type=jnp.float32)
        ppad = h.shape[-1]

        # pe_ref already holds (projection bias + positional encoding), f32.
        if Bt == 1:
            h = h + pe_ref[...]
        elif S % 8 == 0:
            h = (h.reshape(Bt, S, ppad) + pe_ref[...][None]).reshape(R, ppad)
        else:  # fallback (only reachable when Bt == B and S % 8 != 0)
            h = h + jnp.tile(pe_ref[...], (Bt, 1))

        # hoisted within-sequence time index, reused by every causal mask
        time_col = jax.lax.broadcasted_iota(jnp.int32, (R, 1), 0) % S

        # ---- causal dilated conv stack: fused-tap matmuls ----
        for l in range(num_layers):
            w_ref = conv_refs[2 * l]        # (n_taps*Cin_pad, Cout_pad) bf16
            b_ref = conv_refs[2 * l + 1]    # (1, Cout_pad)              f32
            slabs = []
            for s in active_shifts[l]:
                if s == 0:
                    slabs.append(h.astype(jnp.bfloat16))
                else:
                    rolled = pltpu.roll(h, shift=s, axis=0)
                    masked = jnp.where(time_col >= s, rolled, 0.0)
                    slabs.append(masked.astype(jnp.bfloat16))
            x_cat = slabs[0] if len(slabs) == 1 else jnp.concatenate(slabs, -1)
            acc = jnp.dot(x_cat, w_ref[...],
                          preferred_element_type=jnp.float32)
            h = jnp.maximum(acc + b_ref[...], 0.0)                # ReLU

        # ---- LayerNorm (single pass) over the REAL channels (eps=1e-5) ----
        # INVARIANT: padded lanes of h are exactly zero (zero-padded weights
        # and biases + ReLU), so full-lane sums equal sums over real channels.
        inv_n = 1.0 / float(c_real_out)
        mean = jnp.sum(h, axis=-1, keepdims=True) * inv_n
        ex2 = jnp.sum(h * h, axis=-1, keepdims=True) * inv_n
        var = ex2 - mean * mean
        y = (h - mean) * jax.lax.rsqrt(var + 1e-5)
        y = y * gamma_ref[...] + beta_ref[...]

        # Store only the real channel lanes (no padded-lane write traffic).
        out_ref[...] = y[:, :c_real_out].astype(out_ref.dtype)

    return kernel


# -------------------------------- wrapper ------------------------------------

def per_sensor_encoder_cnn(x, params, *, num_layers, kernel_size, dilation_base):
    B, S, Din = x.shape
    P = params["wp"].shape[1]
    Cout = params["gamma"].shape[1]
    dilations = [dilation_base ** i for i in range(num_layers)]

    LANE = 128
    Ppad = _round_up(P, LANE)
    Cpad = _round_up(Cout, LANE)

    # Pad channels to lane multiples, pre-cast matmul weights to bf16.
    # Zero padding keeps padded lanes exactly zero through the whole stack
    # (the LayerNorm statistics depend on this invariant).
    wp = _pad_last(params["wp"], Ppad).astype(jnp.bfloat16)
    pe_fused = _pad_last(params["bp"] + params["pe"][:S], Ppad).astype(jnp.float32)

    conv_inputs = []
    active_shifts = []
    in_pad = Ppad
    for i, (w, b) in enumerate(params["conv"]):
        out_pad = Cpad if i == num_layers - 1 else Ppad
        k, cin, cout = w.shape
        d = dilations[i]
        shifts = [(k - 1 - j) * d for j in range(k)]
        keep = [j for j, s in enumerate(shifts) if s < S]   # drop dead taps
        active_shifts.append(tuple(shifts[j] for j in keep))
        wz = jnp.zeros((len(keep), in_pad, out_pad), jnp.float32)
        for idx, j in enumerate(keep):
            wz = wz.at[idx, :cin, :cout].set(w[j])
        # fused-tap layout: rows [t*Cin_pad:(t+1)*Cin_pad] are kept tap t
        conv_inputs.append(wz.reshape(len(keep) * in_pad, out_pad)
                           .astype(jnp.bfloat16))
        conv_inputs.append(_pad_last(b, out_pad).astype(jnp.float32))
        in_pad = out_pad

    gamma = _pad_last(params["gamma"], Cpad).astype(jnp.float32)
    beta = _pad_last(params["beta"], Cpad).astype(jnp.float32)

    # Tile sizing from the per-core VMEM budget (v7x ~32 MiB, v5e/v6e ~64 MiB).
    vmem_budget = _vmem_budget_bytes()
    if vmem_budget <= 32 * 1024 * 1024:
        target_rows, max_rows = 1024, 4096
    else:
        target_rows, max_rows = 2048, 8192
    Bt = _pick_batch_tile(B, S, target_rows, max_rows)
    R = Bt * S
    grid = (B // Bt,)

    # Flattened I/O (free metadata reshapes outside the kernel).
    # NOTE: the (R, Din) x block is lane-sparse when Din << 128; its VMEM cost
    # is accounted for in max_rows above.
    x_flat = x.reshape(B * S, Din)

    kernel = make_kernel(tuple(active_shifts), Bt, S, Cout)

    def const_spec(arr):
        zeros = (0,) * arr.ndim
        return pl.BlockSpec(arr.shape, lambda b, _z=zeros: _z)

    inputs = [x_flat, wp, pe_fused] + conv_inputs + [gamma, beta]
    in_specs = [pl.BlockSpec((R, Din), lambda b: (b, 0))]
    in_specs += [const_spec(a) for a in inputs[1:]]

    out_flat = pl.pallas_call(
        kernel,
        out_shape=jax.ShapeDtypeStruct((B * S, Cout), jnp.float32),
        grid=grid,
        in_specs=in_specs,
        out_specs=pl.BlockSpec((R, Cout), lambda b: (b, 0)),
        compiler_params=pltpu.CompilerParams(
            dimension_semantics=("parallel",),    # 2 grid steps -> both v7x TCs
            vmem_limit_bytes=vmem_budget,
        ),
    )(*inputs)
    return out_flat.reshape(B, S, Cout)


# --------------------------- param construction ------------------------------

def make_positional_encoding(seq_len, d_model):
    position = np.arange(seq_len, dtype=np.float32)[:, None]
    div_term = np.exp(np.arange(0, d_model, 2, dtype=np.float32)
                      * (-math.log(10000.0) / d_model))
    pe = np.zeros((seq_len, d_model), dtype=np.float32)
    pe[:, 0::2] = np.sin(position * div_term)
    pe[:, 1::2] = np.cos(position * div_term)
    return jnp.asarray(pe)


def init_params(key, input_dim, proj_dim, cnn_out_dim, seq_len,
                num_layers, kernel_size):
    keys = jax.random.split(key, 2 + 2 * num_layers)
    params = {}
    params["wp"] = 0.1 * jax.random.normal(keys[0], (input_dim, proj_dim),
                                           jnp.float32)
    params["bp"] = 0.1 * jax.random.normal(keys[1], (1, proj_dim), jnp.float32)
    params["pe"] = make_positional_encoding(seq_len, proj_dim)

    conv = []
    current = proj_dim
    for i in range(num_layers):
        out_d = cnn_out_dim if i == num_layers - 1 else proj_dim
        w = 0.1 * jax.random.normal(keys[2 + 2 * i],
                                    (kernel_size, current, out_d), jnp.float32)
        b = 0.1 * jax.random.normal(keys[3 + 2 * i], (1, out_d), jnp.float32)
        conv.append((w, b))
        current = out_d
    params["conv"] = conv
    params["gamma"] = jnp.ones((1, cnn_out_dim), jnp.float32)
    params["beta"] = jnp.zeros((1, cnn_out_dim), jnp.float32)
    return params


# ------------------------- pure-JAX reference check --------------------------
# Mirrors the kernel's bf16-at-the-matmul-boundary / f32-accumulate numerics.

def reference(x, params, *, num_layers, kernel_size, dilation_base):
    bf16 = jnp.bfloat16
    h = jnp.einsum("bsd,dp->bsp", x.astype(bf16), params["wp"].astype(bf16),
                   preferred_element_type=jnp.float32)
    h = h + params["bp"] + params["pe"][None]
    B, S, _ = h.shape
    for l, (w, b) in enumerate(params["conv"]):
        d = dilation_base ** l
        p = (kernel_size - 1) * d
        hb = jnp.pad(h.astype(bf16), ((0, 0), (p, 0), (0, 0)))
        acc = jnp.zeros((B, S, w.shape[2]), jnp.float32)
        for j in range(kernel_size):
            acc = acc + jnp.einsum("bsc,cd->bsd",
                                   hb[:, j * d:j * d + S, :],
                                   w[j].astype(bf16),
                                   preferred_element_type=jnp.float32)
        h = jnp.maximum(acc + b, 0.0)
    mean = h.mean(-1, keepdims=True)
    var = ((h - mean) ** 2).mean(-1, keepdims=True)
    return ((h - mean) * jax.lax.rsqrt(var + 1e-5)
            * params["gamma"] + params["beta"])


# ----------------------------------- main -------------------------------------

if __name__ == "__main__":
    # Small config consistent with the module's __init__ signature.
    B, seq_len = 2, 16
    input_dim, proj_dim, cnn_out_dim = 4, 32, 32
    num_layers, kernel_size, dilation_base = 2, 3, 2

    key = jax.random.PRNGKey(0)
    kx, kp = jax.random.split(key)
    x = jax.random.normal(kx, (B, seq_len, input_dim), jnp.float32)
    params = init_params(kp, input_dim, proj_dim, cnn_out_dim, seq_len,
                         num_layers, kernel_size)

    out = per_sensor_encoder_cnn(
        x, params,
        num_layers=num_layers,
        kernel_size=kernel_size,
        dilation_base=dilation_base,
    )
    out = jax.block_until_ready(out)

    ref = reference(x, params,
                    num_layers=num_layers,
                    kernel_size=kernel_size,
                    dilation_base=dilation_base)
    np.testing.assert_allclose(np.asarray(out), np.asarray(ref),
                               rtol=5e-3, atol=5e-3)
    print("KERNEL_OK")
</pallas_src>

<mosaic_0001>
module attributes {stable_mosaic.version = 11 : i64} {
  func.func @kernel(%arg0: i32, %arg1: memref<16x4xf32, #tpu.memory_space<vmem>>, %arg2: memref<4x128xbf16, #tpu.memory_space<vmem>>, %arg3: memref<16x128xf32, #tpu.memory_space<vmem>>, %arg4: memref<384x128xbf16, #tpu.memory_space<vmem>>, %arg5: memref<1x128xf32, #tpu.memory_space<vmem>>, %arg6: memref<384x128xbf16, #tpu.memory_space<vmem>>, %arg7: memref<1x128xf32, #tpu.memory_space<vmem>>, %arg8: memref<1x128xf32, #tpu.memory_space<vmem>>, %arg9: memref<1x128xf32, #tpu.memory_space<vmem>>, %arg10: memref<16x32xf32, #tpu.memory_space<vmem>>) attributes {dimension_semantics = [#tpu.dimension_semantics<parallel>], iteration_bounds = array<i64: 2>, scalar_prefetch = 0 : i64, scratch_operands = 0 : i64, tpu.core_type = #tpu.core_type<tc>, window_params = [{transform_indices = @transform_0, window_bounds = array<i64: 16, 4>}, {pipeline_mode = #tpu.pipeline_mode<synchronous>, transform_indices = @transform_1, window_bounds = array<i64: 4, 128>}, {pipeline_mode = #tpu.pipeline_mode<synchronous>, transform_indices = @transform_2, window_bounds = array<i64: 16, 128>}, {pipeline_mode = #tpu.pipeline_mode<synchronous>, transform_indices = @transform_3, window_bounds = array<i64: 384, 128>}, {pipeline_mode = #tpu.pipeline_mode<synchronous>, transform_indices = @transform_4, window_bounds = array<i64: 1, 128>}, {pipeline_mode = #tpu.pipeline_mode<synchronous>, transform_indices = @transform_5, window_bounds = array<i64: 384, 128>}, {pipeline_mode = #tpu.pipeline_mode<synchronous>, transform_indices = @transform_6, window_bounds = array<i64: 1, 128>}, {pipeline_mode = #tpu.pipeline_mode<synchronous>, transform_indices = @transform_7, window_bounds = array<i64: 1, 128>}, {pipeline_mode = #tpu.pipeline_mode<synchronous>, transform_indices = @transform_8, window_bounds = array<i64: 1, 128>}, {transform_indices = @transform_9, window_bounds = array<i64: 16, 32>}]} {
    %c0 = arith.constant 0 : index
    %c0_0 = arith.constant 0 : index
    %0 = vector.load %arg1[%c0, %c0_0] : memref<16x4xf32, #tpu.memory_space<vmem>>, vector<16x4xf32>
    %1 = arith.truncf %0 : vector<16x4xf32> to vector<16x4xbf16>
    %c0_1 = arith.constant 0 : index
    %c0_2 = arith.constant 0 : index
    %2 = vector.load %arg2[%c0_1, %c0_2] : memref<4x128xbf16, #tpu.memory_space<vmem>>, vector<4x128xbf16>
    %cst = arith.constant dense<0.000000e+00> : vector<16x128xf32>
    %3 = tpu.matmul %1, %2, %cst {dimension_numbers = #tpu.dot_dimension_numbers<[1], [0], [0], [1], [0, 0, 1, 1], [], []>} : vector<16x4xbf16>, vector<4x128xbf16>, vector<16x128xf32> -> vector<16x128xf32>
    %c0_3 = arith.constant 0 : index
    %c0_4 = arith.constant 0 : index
    %4 = vector.load %arg3[%c0_3, %c0_4] : memref<16x128xf32, #tpu.memory_space<vmem>>, vector<16x128xf32>
    %5 = arith.addf %3, %4 : vector<16x128xf32>
    %6 = tpu.iota {dimensions = array<i32: 0>} : vector<16x1xi32>
    %c16_i32 = arith.constant 16 : i32
    %c0_i32 = arith.constant 0 : i32
    %7 = arith.cmpi eq, %c16_i32, %c0_i32 : i32
    %c1_i32 = arith.constant 1 : i32
    %8 = arith.select %7, %c1_i32, %c16_i32 : i32
    %9 = vector.broadcast %8 : i32 to vector<16x1xi32>
    %10 = arith.remsi %6, %9 : vector<16x1xi32>
    %c0_i32_5 = arith.constant 0 : i32
    %11 = vector.broadcast %c0_i32_5 : i32 to vector<16x1xi32>
    %12 = arith.cmpi ne, %10, %11 : vector<16x1xi32>
    %c0_i32_6 = arith.constant 0 : i32
    %13 = vector.broadcast %c0_i32_6 : i32 to vector<16x1xi32>
    %14 = arith.cmpi slt, %10, %13 : vector<16x1xi32>
    %c0_i32_7 = arith.constant 0 : i32
    %15 = arith.cmpi slt, %8, %c0_i32_7 : i32
    %16 = vector.broadcast %15 : i1 to vector<16x1xi1>
    %17 = vector.broadcast %16 : vector<16x1xi1> to vector<16x1xi1>
    %18 = arith.xori %14, %17 : vector<16x1xi1>
    %19 = arith.andi %18, %12 : vector<16x1xi1>
    %20 = vector.broadcast %8 : i32 to vector<16x1xi32>
    %21 = arith.addi %10, %20 : vector<16x1xi32>
    %22 = arith.select %19, %21, %10 : vector<16x1xi1>, vector<16x1xi32>
    %c2_i32 = arith.constant 2 : i32
    %23 = tpu.dynamic_rotate %5 by %c2_i32 dim 0 : vector<16x128xf32>, i32 -> vector<16x128xf32>
    %c2_i32_8 = arith.constant 2 : i32
    %24 = vector.broadcast %c2_i32_8 : i32 to vector<16x1xi32>
    %25 = arith.cmpi sge, %22, %24 : vector<16x1xi32>
    %cst_9 = arith.constant 0.000000e+00 : f32
    %26 = vector.shape_cast %25 : vector<16x1xi1> to vector<16x1xi1>
    %27 = vector.broadcast %26 : vector<16x1xi1> to vector<16x128xi1>
    %28 = vector.broadcast %cst_9 : f32 to vector<16x128xf32>
    %29 = arith.select %27, %23, %28 : vector<16x128xi1>, vector<16x128xf32>
    %30 = arith.truncf %29 : vector<16x128xf32> to vector<16x128xbf16>
    %c1_i32_10 = arith.constant 1 : i32
    %31 = tpu.dynamic_rotate %5 by %c1_i32_10 dim 0 : vector<16x128xf32>, i32 -> vector<16x128xf32>
    %c1_i32_11 = arith.constant 1 : i32
    %32 = vector.broadcast %c1_i32_11 : i32 to vector<16x1xi32>
    %33 = arith.cmpi sge, %22, %32 : vector<16x1xi32>
    %cst_12 = arith.constant 0.000000e+00 : f32
    %34 = vector.shape_cast %33 : vector<16x1xi1> to vector<16x1xi1>
    %35 = vector.broadcast %34 : vector<16x1xi1> to vector<16x128xi1>
    %36 = vector.broadcast %cst_12 : f32 to vector<16x128xf32>
    %37 = arith.select %35, %31, %36 : vector<16x128xi1>, vector<16x128xf32>
    %38 = arith.truncf %37 : vector<16x128xf32> to vector<16x128xbf16>
    %39 = arith.truncf %5 : vector<16x128xf32> to vector<16x128xbf16>
    %40 = tpu.concatenate %30, %38, %39 in 1 : vector<16x128xbf16>, vector<16x128xbf16>, vector<16x128xbf16> -> vector<16x384xbf16>
    %c0_13 = arith.constant 0 : index
    %c0_14 = arith.constant 0 : index
    %41 = vector.load %arg4[%c0_13, %c0_14] : memref<384x128xbf16, #tpu.memory_space<vmem>>, vector<384x128xbf16>
    %cst_15 = arith.constant dense<0.000000e+00> : vector<16x128xf32>
    %42 = tpu.matmul %40, %41, %cst_15 {dimension_numbers = #tpu.dot_dimension_numbers<[1], [0], [0], [1], [0, 0, 1, 1], [], []>} : vector<16x384xbf16>, vector<384x128xbf16>, vector<16x128xf32> -> vector<16x128xf32>
    %c0_16 = arith.constant 0 : index
    %c0_17 = arith.constant 0 : index
    %43 = vector.load %arg5[%c0_16, %c0_17] : memref<1x128xf32, #tpu.memory_space<vmem>>, vector<1x128xf32>
    %44 = vector.broadcast %43 : vector<1x128xf32> to vector<16x128xf32>
    %45 = arith.addf %42, %44 : vector<16x128xf32>
    %cst_18 = arith.constant 0.000000e+00 : f32
    %46 = vector.broadcast %cst_18 : f32 to vector<16x128xf32>
    %47 = arith.maximumf %45, %46 : vector<16x128xf32>
    %c4_i32 = arith.constant 4 : i32
    %48 = tpu.dynamic_rotate %47 by %c4_i32 dim 0 : vector<16x128xf32>, i32 -> vector<16x128xf32>
    %c4_i32_19 = arith.constant 4 : i32
    %49 = vector.broadcast %c4_i32_19 : i32 to vector<16x1xi32>
    %50 = arith.cmpi sge, %22, %49 : vector<16x1xi32>
    %cst_20 = arith.constant 0.000000e+00 : f32
    %51 = vector.shape_cast %50 : vector<16x1xi1> to vector<16x1xi1>
    %52 = vector.broadcast %51 : vector<16x1xi1> to vector<16x128xi1>
    %53 = vector.broadcast %cst_20 : f32 to vector<16x128xf32>
    %54 = arith.select %52, %48, %53 : vector<16x128xi1>, vector<16x128xf32>
    %55 = arith.truncf %54 : vector<16x128xf32> to vector<16x128xbf16>
    %c2_i32_21 = arith.constant 2 : i32
    %56 = tpu.dynamic_rotate %47 by %c2_i32_21 dim 0 : vector<16x128xf32>, i32 -> vector<16x128xf32>
    %c2_i32_22 = arith.constant 2 : i32
    %57 = vector.broadcast %c2_i32_22 : i32 to vector<16x1xi32>
    %58 = arith.cmpi sge, %22, %57 : vector<16x1xi32>
    %cst_23 = arith.constant 0.000000e+00 : f32
    %59 = vector.shape_cast %58 : vector<16x1xi1> to vector<16x1xi1>
    %60 = vector.broadcast %59 : vector<16x1xi1> to vector<16x128xi1>
    %61 = vector.broadcast %cst_23 : f32 to vector<16x128xf32>
    %62 = arith.select %60, %56, %61 : vector<16x128xi1>, vector<16x128xf32>
    %63 = arith.truncf %62 : vector<16x128xf32> to vector<16x128xbf16>
    %64 = arith.truncf %47 : vector<16x128xf32> to vector<16x128xbf16>
    %65 = tpu.concatenate %55, %63, %64 in 1 : vector<16x128xbf16>, vector<16x128xbf16>, vector<16x128xbf16> -> vector<16x384xbf16>
    %c0_24 = arith.constant 0 : index
    %c0_25 = arith.constant 0 : index
    %66 = vector.load %arg6[%c0_24, %c0_25] : memref<384x128xbf16, #tpu.memory_space<vmem>>, vector<384x128xbf16>
    %cst_26 = arith.constant dense<0.000000e+00> : vector<16x128xf32>
    %67 = tpu.matmul %65, %66, %cst_26 {dimension_numbers = #tpu.dot_dimension_numbers<[1], [0], [0], [1], [0, 0, 1, 1], [], []>} : vector<16x384xbf16>, vector<384x128xbf16>, vector<16x128xf32> -> vector<16x128xf32>
    %c0_27 = arith.constant 0 : index
    %c0_28 = arith.constant 0 : index
    %68 = vector.load %arg7[%c0_27, %c0_28] : memref<1x128xf32, #tpu.memory_space<vmem>>, vector<1x128xf32>
    %69 = vector.broadcast %68 : vector<1x128xf32> to vector<16x128xf32>
    %70 = arith.addf %67, %69 : vector<16x128xf32>
    %cst_29 = arith.constant 0.000000e+00 : f32
    %71 = vector.broadcast %cst_29 : f32 to vector<16x128xf32>
    %72 = arith.maximumf %70, %71 : vector<16x128xf32>
    %cst_30 = arith.constant dense<0.000000e+00> : vector<16xf32>
    %73 = vector.multi_reduction <add>, %72, %cst_30 [1] : vector<16x128xf32> to vector<16xf32>
    %74 = vector.shape_cast %73 : vector<16xf32> to vector<16x1xf32>
    %cst_31 = arith.constant 3.125000e-02 : f32
    %75 = vector.broadcast %cst_31 : f32 to vector<16x1xf32>
    %76 = arith.mulf %74, %75 : vector<16x1xf32>
    %77 = arith.mulf %72, %72 : vector<16x128xf32>
    %cst_32 = arith.constant dense<0.000000e+00> : vector<16xf32>
    %78 = vector.multi_reduction <add>, %77, %cst_32 [1] : vector<16x128xf32> to vector<16xf32>
    %79 = vector.shape_cast %78 : vector<16xf32> to vector<16x1xf32>
    %cst_33 = arith.constant 3.125000e-02 : f32
    %80 = vector.broadcast %cst_33 : f32 to vector<16x1xf32>
    %81 = arith.mulf %79, %80 : vector<16x1xf32>
    %82 = arith.mulf %76, %76 : vector<16x1xf32>
    %83 = arith.subf %81, %82 : vector<16x1xf32>
    %84 = vector.broadcast %76 : vector<16x1xf32> to vector<16x128xf32>
    %85 = arith.subf %72, %84 : vector<16x128xf32>
    %cst_34 = arith.constant 9.99999974E-6 : f32
    %86 = vector.broadcast %cst_34 : f32 to vector<16x1xf32>
    %87 = arith.addf %83, %86 : vector<16x1xf32>
    %88 = math.rsqrt %87 : vector<16x1xf32>
    %89 = vector.broadcast %88 : vector<16x1xf32> to vector<16x128xf32>
    %90 = arith.mulf %85, %89 : vector<16x128xf32>
    %c0_35 = arith.constant 0 : index
    %c0_36 = arith.constant 0 : index
    %91 = vector.load %arg8[%c0_35, %c0_36] : memref<1x128xf32, #tpu.memory_space<vmem>>, vector<1x128xf32>
    %92 = vector.broadcast %91 : vector<1x128xf32> to vector<16x128xf32>
    %93 = arith.mulf %90, %92 : vector<16x128xf32>
    %c0_37 = arith.constant 0 : index
    %c0_38 = arith.constant 0 : index
    %94 = vector.load %arg9[%c0_37, %c0_38] : memref<1x128xf32, #tpu.memory_space<vmem>>, vector<1x128xf32>
    %95 = vector.broadcast %94 : vector<1x128xf32> to vector<16x128xf32>
    %96 = arith.addf %93, %95 : vector<16x128xf32>
    %97 = vector.extract_strided_slice %96 {offsets = [0, 0], sizes = [16, 32], strides = [1, 1]} : vector<16x128xf32> to vector<16x32xf32>
    %c0_39 = arith.constant 0 : index
    %c0_40 = arith.constant 0 : index
    %98 = vector.load %arg10[%c0_39, %c0_40] : memref<16x32xf32, #tpu.memory_space<vmem>>, vector<16x32xf32>
    tpu.vector_store %arg10[%c0_39, %c0_40], %97 {strides = array<i32>} : memref<16x32xf32, #tpu.memory_space<vmem>>, vector<16x32xf32>,
    return
  }
  func.func @transform_0(%arg0: i32) -> (i32, i32) {
    %c0_i32 = arith.constant 0 : i32
    %c0_i32_0 = arith.constant 0 : i32
    return %arg0, %c0_i32 : i32, i32
  }
  func.func @transform_1(%arg0: i32) -> (i32, i32) {
    %c0_i32 = arith.constant 0 : i32
    %c0_i32_0 = arith.constant 0 : i32
    %c0_i32_1 = arith.constant 0 : i32
    return %c0_i32, %c0_i32_0 : i32, i32
  }
  func.func @transform_2(%arg0: i32) -> (i32, i32) {
    %c0_i32 = arith.constant 0 : i32
    %c0_i32_0 = arith.constant 0 : i32
    %c0_i32_1 = arith.constant 0 : i32
    return %c0_i32, %c0_i32_0 : i32, i32
  }
  func.func @transform_3(%arg0: i32) -> (i32, i32) {
    %c0_i32 = arith.constant 0 : i32
    %c0_i32_0 = arith.constant 0 : i32
    %c0_i32_1 = arith.constant 0 : i32
    return %c0_i32, %c0_i32_0 : i32, i32
  }
  func.func @transform_4(%arg0: i32) -> (i32, i32) {
    %c0_i32 = arith.constant 0 : i32
    %c0_i32_0 = arith.constant 0 : i32
    %c0_i32_1 = arith.constant 0 : i32
    return %c0_i32, %c0_i32_0 : i32, i32
  }
  func.func @transform_5(%arg0: i32) -> (i32, i32) {
    %c0_i32 = arith.constant 0 : i32
    %c0_i32_0 = arith.constant 0 : i32
    %c0_i32_1 = arith.constant 0 : i32
    return %c0_i32, %c0_i32_0 : i32, i32
  }
  func.func @transform_6(%arg0: i32) -> (i32, i32) {
    %c0_i32 = arith.constant 0 : i32
    %c0_i32_0 = arith.constant 0 : i32
    %c0_i32_1 = arith.constant 0 : i32
    return %c0_i32, %c0_i32_0 : i32, i32
  }
  func.func @transform_7(%arg0: i32) -> (i32, i32) {
    %c0_i32 = arith.constant 0 : i32
    %c0_i32_0 = arith.constant 0 : i32
    %c0_i32_1 = arith.constant 0 : i32
    return %c0_i32, %c0_i32_0 : i32, i32
  }
  func.func @transform_8(%arg0: i32) -> (i32, i32) {
    %c0_i32 = arith.constant 0 : i32
    %c0_i32_0 = arith.constant 0 : i32
    %c0_i32_1 = arith.constant 0 : i32
    return %c0_i32, %c0_i32_0 : i32, i32
  }
  func.func @transform_9(%arg0: i32) -> (i32, i32) {
    %c0_i32 = arith.constant 0 : i32
    %c0_i32_0 = arith.constant 0 : i32
    return %arg0, %c0_i32 : i32, i32
  }
}

</mosaic_0001>

<bundles_post_ra>
// kernel: tpu_custom_call.1
= control target key start
LH: loop header
LB: loop body
LE: loop exit
PB: predicated region body
PF: predicated region fallthrough
CT: control target
= control target key end

     0   :  { %14 = vsyncpa [#allocation3], 0  ;;  %s1919_s0 = inlined_call_operand.vmem [shape: f32[32,4], index: 0, kind: input, shape index: {}]   ;;  %s1920_s1 = inlined_call_operand.vmem [shape: bf16[4,128], index: 1, kind: input, shape index: {}]   ;;  %s1921_s2 = inlined_call_operand.vmem [shape: f32[16,128], index: 2, kind: input, shape index: {}]   ;;  %s1922_s3 = inlined_call_operand.hbm [shape: bf16[384,128], index: 3, kind: input, shape index: {}]   ;;  %s1923_s4 = inlined_call_operand.vmem [shape: f32[1,128], index: 4, kind: input, shape index: {}]   ;;  %s1924_s5 = inlined_call_operand.hbm [shape: bf16[384,128], index: 5, kind: input, shape index: {}]   ;;  %s1925_s6 = inlined_call_operand.vmem [shape: f32[1,128], index: 6, kind: input, shape index: {}]   ;;  %s1926_s7 = inlined_call_operand.vmem [shape: f32[1,128], index: 7, kind: input, shape index: {}]   ;;  %s1927_s8 = inlined_call_operand.vmem [shape: f32[1,128], index: 8, kind: input, shape index: {}]   ;;  %s1928_s9 = inlined_call_operand.hbm [shape: f32[32,32], index: 9, kind: output, shape index: {}]  }
   0x1   :  { %15 = vsyncpa [#allocation6], 0 }
   0x2   :  { %16 = vsyncpa [#allocation4], 0 }
   0x3   :  { %18 = vsyncpa [#allocation4 + $0x1], 0  ;;  %s1702_s30 = smov 0   ;;  %s1704_s10 = smov 0  }
   0x4   :  { %s1706_s11 = smov 0   ;;  %s1708_s12 = smov 0  }
   0x5 LB: > { %s1723_s13 = sadd.s32 4294967295, %s1640_s12   ;;  %s1209_s14 = sadd.s32 4294967294, %s1640_s12   ;;  %s1640_s12 = sphi %s1708_s12, %s1946_s12   ;;  %s1636_s11 = sphi %s1706_s11, %s1945_s11   ;;  %s1632_s10 = sphi %s1704_s10, %s1944_s10   ;;  %s1628_s30 = sphi %s1702_s30, %s1943_s30  }
   0x6   : > { %s1727_s15 = sadd.s32 1, %s1640_s12   ;;  %s225_s16 = sadd.s32 1, %s1636_s11 }
   0x7   : > { %s222_s17 = ssub.s32 %s1640_s12, %s1727_s15  ;;  %p235_p0 = scmp.ne.s32.totalorder %s1636_s11, %s1632_s10 }
   0x8   : > { %p223_p1 = scmp.eq.s32.totalorder %s222_s17, 0  ;;  %p236_p2 = scmp.eq.s32.totalorder %s1723_s13, 1 }
   0x9   : > { %p241_p3 = scmp.ne.s32.totalorder %s1632_s10, %s1628_s30  ;;  %p242_p4 = scmp.eq.s32.totalorder %s1209_s14, 1 }
   0xa   : > { %s1738_s18 = scalar_select %p223_p1, %s1636_s11, %s225_s16  }
   0xb   : > { %p1740_p5 = por %p236_p2, %p235_p0  ;;  %p1744_p6 = por %p242_p4, %p241_p3 }
   0xc   : > { %p1210_p7 = scmp.ge.s32.totalorder %s1640_s12, 1  ;;  %p249_p8 = scmp.lt.s32.totalorder %s1640_s12, 3 }
   0xd   : > { %s1931_s20 = scalar_select %p1744_p6, 1, 0 }
   0xe   : > { %p1929_p9 = scmp.eq.s32.totalorder %s1723_s13, 0  ;;  %p1751_p10 = pnand %p1210_p7, %p249_p8 }
   0xf   : > { %s1642_s22 = smov [#allocation2]   ;;  %s1643_s25 = smov [#allocation5]  }
  0x10   : > { %s267_s23 = sshll.u32 %s1642_s22, 4  ;;  %p1411_p11 = pneg %p1751_p10  ;;  %s268_s23 = int_to_ptr.vmem [resolvable:$true] %s267_s23 }
  0x11   : > { %s283_s26 = sshll.u32 %s1643_s25, 4  ;;  %s1531_s27 = scalar_lea.vmem %s268_s23, 3072  ;;  %s284_s26 = int_to_ptr.vmem [resolvable:$true] %s283_s26 }
  0x12   : > { %p1759_p12 = pnand %p1929_p9, %p1411_p11  ;;  %p1532_p0 = scmp.ne.s32.totalorder %s268_s23, %s1531_s27 }
  0x13   : > { %p1539_p3 = scmp.lt.s32.totalorder %s268_s23, %s268_s23  ;;  %p1540_p4 = scmp.lt.s32.totalorder %s1531_s27, %s1531_s27 }
  0x14   : > { %p1522_p13 = pneg %p1759_p12 }
  0x15   : > { %p1541_p7 = por %p1540_p4, %p1539_p3 }
  0x16   : > { %p1534_p1 = pnand %p1532_p0, %p1522_p13 }
  0x18   : > { %p1535_p2 = pneg %p1534_p1 }
  0x1a   : > { %p1542_p8 = pnand %p1541_p7, %p1535_p2 }
  0x1c   : > { %1545 = shalt.err (!%p1542_p8)
}
  0x1d   : > { %s1644_s28 = smov 64   ;;  %s1645_s29 = smov 4  }
  0x1e   : > { %1414 = dma.hbm_to_vmem [thread:$0]  (!%p1759_p12), %s1922_s3, 3072, %s268_s23, [#allocation3], %s1644_s28, %s1644_s28, %s1645_s29  }
  0x1f   : > { %s1557_s17 = scalar_lea.vmem %s284_s26, 3072  ;;  %p1565_p9 = scmp.lt.s32.totalorder %s284_s26, %s284_s26 }
  0x20   : > { %p1558_p11 = scmp.ne.s32.totalorder %s284_s26, %s1557_s17  ;;  %p1566_p6 = scmp.lt.s32.totalorder %s1557_s17, %s1557_s17 }
  0x22   : > { %p1560_p0 = pnand %p1558_p11, %p1522_p13  ;;  %p1567_p3 = por %p1566_p6, %p1565_p9 }
  0x24   : > { %p1561_p1 = pneg %p1560_p0 }
  0x26   : > { %p1568_p2 = pnand %p1567_p3, %p1561_p1 }
  0x28   : > { %1571 = shalt.err (!%p1568_p2)
}
  0x29   : > { %1417 = dma.hbm_to_vmem [thread:$0]  (!%p1759_p12), %s1924_s5, 3072, %s284_s26, [#allocation6], %s1644_s28, %s1644_s28, %s1645_s29  }
  0x2a   : > { %317 = sbr.rel (%p1751_p10) target bundleno = 865 (0x361), region = 56  ;;  %p1934_p4 = scmp.eq.s32.totalorder (!%p1751_p10), %s1723_s13, 0 }
  0x2f   : > { %1615 = dma.done.wait (%p1934_p4), [#allocation3], 3072   ;;  %p1935_p13 = pmov %p1934_p4 }
  0x30   : > { %p1936_p7 = pmov %p1934_p4 }
  0x31   : > { %1617 = vsyncadd (%p1935_p13), [#allocation3], 4294964224 }
  0x32   : > { %1619 = dma.done.wait (%p1936_p7), [#allocation6], 3072   ;;  %p1937_p6 = pmov %p1934_p4 }
  0x33   : > { %s1218_s23 = sshll.u32 %s1723_s13, 1  ;;  %v1646_v0 = vmov 0.0   ;;  %vm1647_vm0 = vmmov 0   ;;  %vm375_vm1 = vcmask 1041408   ;;  %v368_v1 = vld [vmem:[%s1920_s1] sm:$0x3]  ;;  %v420_v28 = vlaneseq }
  0x34   : > { %1621 = vsyncadd (%p1937_p6), [#allocation6], 4294964224  ;;  %1355 = vmatprep.subr.bf16.mxu0 %v1646_v0  ;;  %1357 = vmatprep.mubr.msk.bf16.mxu0 %vm1647_vm0, %v1646_v0  ;;  %p358_p9 = scmp.lt.s32.totalorder %s1218_s23, 3  ;;  %v377_v4 = vsel %vm375_vm1, %v368_v1, 0  ;;  %v1468_v6 = vld [vmem:[#allocation2 + $0xb8] sm:$0xff]   ;;  %vm371_vm2 = vcmask 31744  }
  0x35   : > { %1356 = vmatpush3.bf16.msra.mxu0 %v377_v4  ;;  %v1469_v7 = vld [vmem:[#allocation2 + $0x78] sm:$0xff]   ;;  %v1471_v9 = vld [vmem:[#allocation2 + $0xb0] sm:$0xff]   ;;  %v1475_v12 = vld [vmem:[#allocation2 + $0x68] sm:$0xff]   ;;  %v1811_v29 = vshrl.u32 %v420_v28, 7  ;;  %vm1648_vm4 = vmmov 1   ;;  %s354_s26 = sand.u32 1, %s1632_s10  }
  0x36   : > { %s1948_s23 = smov (!%p358_p9, %s1218_s23), 3  ;;  %1361 = vmatprep.subr.bf16.mxu0 %v1646_v0  ;;  %v1470_v8 = vld [vmem:[#allocation2 + $0x38] sm:$0xff]   ;;  %1293 = vmatprep.subr.bf16.mxu1 %v1469_v7  ;;  %v1472_v10 = vld [vmem:[#allocation2 + $0x70] sm:$0xff]   ;;  %v1476_v13 = vld [vmem:[#allocation2 + $0x28] sm:$0xff]   ;;  %s1217_s29 = sshll.u32 %s354_s26, 4  ;;  %vm1108_vm13 = vcmask 261120  }
  0x37   : > { %s1219_s21 = sshll.u32 %s1948_s23, 3  ;;  %1294 = vmatpush3.bf16.msra.mxu1 %v1470_v8  ;;  %v1473_v11 = vld [vmem:[#allocation2 + $0x30] sm:$0xff]   ;;  %v1474_v14 = vld [vmem:[#allocation2 + $0xa8] sm:$0xff]   ;;  %v1478_v15 = vld [vmem:[#allocation2 + $0x60] sm:$0xff]   ;;  %v427_v32 = vand.u32 15, %v1811_v29  ;;  %vm463_vm6 = vcmp.lt.s32.totalorder %v1811_v29, 1 }
  0x38   : > { %s361_s27 = scalar_lea.vmem %s1919_s0, %s1219_s21  ;;  %1295 = vmatprep.subr.bf16.mxu1 %v1472_v10  ;;  %v1477_v16 = vld [vmem:[#allocation2 + $0xa0] sm:$0xff]   ;;  %v1481_v18 = vld [vmem:[#allocation2 + $0x58] sm:$0xff]   ;;  %v1483_v21 = vld [vmem:[#allocation2 + $0x90] sm:$0xff]   ;;  %vm449_vm8 = vcmp.lt.s32.totalorder %v1811_v29, 2  ;;  %vm761_vm12 = vcmp.lt.s32.totalorder %v1811_v29, 4  ;;  %s1290_s17 = sshll.u32 %s1723_s13, 8 }
  0x39   : > { %v365_v2 = vld [vmem:[%s361_s27] sm:$0xff]  ;;  %v366_v3 = vld [vmem:[%s361_s27 + $0x8] sm:$0xff]  ;;  %v1480_v19 = vld [vmem:[#allocation2 + $0x98] sm:$0xff]   ;;  %vm764_vm3 = vcmp.ge.s32.totalorder %v427_v32, 4  ;;  %vm466_vm7 = vcmp.ge.s32.totalorder %v427_v32, 1  ;;  %vm452_vm9 = vcmp.ge.s32.totalorder %v427_v32, 2  ;;  %s1875_s24 = scalar_lea.hbm %s1928_s9, %s1290_s17 }
  0x3a   : > { %v367_v5 = vpack.c.bf16 %v366_v3, %v365_v2  ;;  %v1479_v17 = vld [vmem:[#allocation2 + $0x20] sm:$0xff]   ;;  %v1482_v20 = vld [vmem:[#allocation2 + $0x18] sm:$0xff]   ;;  %v1484_v22 = vld [vmem:[#allocation2 + $0x50] sm:$0xff]   ;;  %s356_s22 = scalar_lea.vmem [#allocation7], %s1217_s29  ;;  %s1879_s27 = scalar_lea.sflag [#allocation4], %s354_s26 }
  0x3b   : > { %1296 = vmatpush3.bf16.msra.mxu1 %v1473_v11  ;;  %v1485_v23 = vld [vmem:[#allocation2 + $0x10] sm:$0xff]   ;;  %v1486_v24 = vld [vmem:[#allocation2 + $0x88] sm:$0xff]   ;;  %v1489_v27 = vld [vmem:[#allocation2 + $0x80] sm:$0xff]   ;;  %s1125_s25 = sshll.u32 %s356_s22, 4  ;;  %s1649_s13 = smov [#allocation7]   ;;  %s1877_s25 = int_to_ptr.vmem [resolvable:$true] %s1125_s25 }
  0x3c   : > { %1358 = vmatmul.mubr.msk.bf16.vlgmr.msra.gmra.mxu0 %vm371_vm2, %v367_v5  ;;  %1297 = vmatprep.subr.bf16.mxu1 %v1475_v12  ;;  %v1487_v25 = vld [vmem:[#allocation2 + $0x48] sm:$0xff]   ;;  %v1490_v30 = vld [vmem:[#allocation2 + $0x40] sm:$0xff]   ;;  %vm1816_vm5 = vmpackc.low %vm1648_vm4, %vm764_vm3  ;;  %s1572_s28 = scalar_lea.vmem %s1877_s25, 256  ;;  %s1576_s29 = sshll.u32 %s1649_s13, 4  ;;  %s1577_s29 = int_to_ptr.vmem [resolvable:$false] %s1576_s29 }
  0x3d   : > { %1362 = vmatpush3.bf16.msra.mxu0 %v1468_v6  ;;  %1377 = vmatprep.mubr.msk.bf16.mxu0 %vm1647_vm0, %v1646_v0  ;;  %v1488_v26 = vld [vmem:[#allocation2 + $0x8] sm:$0xff]   ;;  %v1491_v31 = vld [vmem:[#allocation2] sm:$0xff]   ;;  %v1493_v34 = vld [vmem:[#allocation5 + $0x78] sm:$0xff]   ;;  %p1573_p10 = scmp.ne.s32.totalorder %s1877_s25, %s1572_s28  ;;  %s1578_s14 = scalar_lea.vmem %s1577_s29, 512 }
  0x3e   : > { %1363 = vmatprep.subr.bf16.mxu0 %v1646_v0  ;;  %v369_v35 = vld [vmem:[%s1921_s2] sm:$0xff]  ;;  %v370_v39 = vld [vmem:[%s1921_s2 + $0x8] sm:$0xff]  ;;  %v1492_v44 = vld [vmem:[#allocation5 + $0xb8] sm:$0xff]   ;;  %p1579_p11 = scmp.lt.s32.totalorder %s1877_s25, %s1577_s29  ;;  %p1580_p0 = scmp.lt.s32.totalorder %s1578_s14, %s1572_s28 }
  0x3f   : > { %1298 = vmatpush3.bf16.msra.mxu1 %v1476_v13  ;;  %vm1246_vm10 = vmpackc.low %vm1648_vm4, %vm466_vm7  ;;  %v1494_v56 = vld [vmem:[#allocation5 + $0x38] sm:$0xff]   ;;  %v1495_v57 = vld [vmem:[#allocation5 + $0xb0] sm:$0xff]   ;;  %p1574_p12 = pnand %p1573_p10, %p1740_p5 }
  0x40   : > { %1299 = vmatprep.subr.bf16.mxu1 %v1478_v15  ;;  %vm1834_vm11 = vmpackc.low %vm1648_vm4, %vm452_vm9  ;;  %v1496_v58 = vld [vmem:[#allocation5 + $0x70] sm:$0xff]   ;;  %v1498_v60 = vld [vmem:[#allocation5 + $0xa8] sm:$0xff]   ;;  %p1581_p1 = por %p1580_p0, %p1579_p11 }
  0x41   : > { %1364 = vmatpush3.bf16.msra.mxu0 %v1471_v9  ;;  %v1497_v59 = vld [vmem:[#allocation5 + $0x30] sm:$0xff]   ;;  %v1499_v61 = vld [vmem:[#allocation5 + $0x68] sm:$0xff]   ;;  %v1501_v63 = vld [vmem:[#allocation5 + $0xa0] sm:$0xff]   ;;  %p1575_p8 = pneg %p1574_p12 }
  0x42   : > { %1365 = vmatprep.subr.bf16.mxu0 %v1646_v0  ;;  %v1500_v62 = vld [vmem:[#allocation5 + $0x28] sm:$0xff]   ;;  %v1502_v1 = vld [vmem:[#allocation5 + $0x60] sm:$0xff]   ;;  %v1504_v3 = vld [vmem:[#allocation5 + $0x98] sm:$0xff]  }
  0x43   : > { %1300 = vmatpush3.bf16.msra.mxu1 %v1479_v17  ;;  %v1503_v2 = vld [vmem:[#allocation5 + $0x20] sm:$0xff]   ;;  %v1505_v4 = vld [vmem:[#allocation5 + $0x58] sm:$0xff]   ;;  %v1507_v6 = vld [vmem:[#allocation5 + $0x90] sm:$0xff]   ;;  %p1582_p3 = pnand %p1581_p1, %p1575_p8 }
  0x44   : > { %1301 = vmatprep.subr.bf16.mxu1 %v1481_v18  ;;  %v1506_v5 = vld [vmem:[#allocation5 + $0x18] sm:$0xff]   ;;  %v1508_v7 = vld [vmem:[#allocation5 + $0x50] sm:$0xff]   ;;  %v1510_v9 = vld [vmem:[#allocation5 + $0x88] sm:$0xff]  }
  0x45   : > { %1366 = vmatpush3.bf16.msra.mxu0 %v1474_v14  ;;  %v1509_v8 = vld [vmem:[#allocation5 + $0x10] sm:$0xff]   ;;  %v1511_v10 = vld [vmem:[#allocation5 + $0x48] sm:$0xff]   ;;  %v1513_v12 = vld [vmem:[#allocation5 + $0x80] sm:$0xff]  }
  0x46   : > { %1367 = vmatprep.subr.bf16.mxu0 %v1646_v0  ;;  %v1512_v11 = vld [vmem:[#allocation5 + $0x8] sm:$0xff]   ;;  %v1514_v13 = vld [vmem:[#allocation5 + $0x40] sm:$0xff]  }
  0x47   : > { %1302 = vmatpush3.bf16.msra.mxu1 %v1482_v20  ;;  %v1515_v14 = vld [vmem:[#allocation5] sm:$0xff]  }
  0x48   : > { %1303 = vmatprep.subr.bf16.mxu1 %v1484_v22 }
  0x49   : > { %1368 = vmatpush3.bf16.msra.mxu0 %v1477_v16 }
  0x4a   : > { %1369 = vmatprep.subr.bf16.mxu0 %v1646_v0 }
  0x4b   : > { %1304 = vmatpush3.bf16.msra.mxu1 %v1485_v23 }
  0x4c   : > { %1305 = vmatprep.subr.bf16.mxu1 %v1487_v25 }
  0x4d   : > { %1370 = vmatpush3.bf16.msra.mxu0 %v1480_v19  ;;  %v1221_v19 = vld [vmem:[%s1923_s4] ss:$0 sm:$0xff] }
  0x4e   : > { %1371 = vmatprep.subr.bf16.mxu0 %v1646_v0 }
  0x4f   : > { %1306 = vmatpush3.bf16.msra.mxu1 %v1488_v26 }
  0x50   : > { %1307 = vmatprep.subr.bf16.mxu1 %v1490_v30 }
  0x51   : > { %1372 = vmatpush3.bf16.msra.mxu0 %v1483_v21 }
  0x52   : > { %1373 = vmatprep.subr.bf16.mxu0 %v1646_v0 }
  0x53   : > { %1308 = vmatpush3.bf16.msra.mxu1 %v1491_v31 }
  0x54   : > { %1324 = vmatprep.subr.bf16.mxu1 %v1493_v34 }
  0x55   : > { %1374 = vmatpush3.bf16.msra.mxu0 %v1486_v24 }
  0x56   : > { %1375 = vmatprep.subr.bf16.mxu0 %v1646_v0 }
  0x59   : > { %1376 = vmatpush3.bf16.msra.mxu0 %v1489_v27 }
  0x5a   : > { %1381 = vmatprep.subr.bf16.mxu0 %v1646_v0 }
  0xfc   : > { %v413_v36 = vpop.f32.mrf.mxu0 }
  0xfd   : > { %v414_v37 = vadd.f32 %v413_v36, %v369_v35 }
  0xfe   : > { %v1359_v38 = vpop.f32.mrf.mxu0 }
  0xff   : > { %v447_v42 = vrot.slane %v414_v37, 6  ;;  %v461_v45 = vrot.slane %v414_v37, 7 }
 0x100   : > { %v416_v40 = vpop.f32.mrf.mxu0 }
 0x101   : > { %v417_v41 = vadd.f32 %v416_v40, %v370_v39 }
 0x102   : > { %v1360_v43 = vpop.f32.mrf.mxu0 }
 0x103   : > { %v448_v46 = vrot.slane %v417_v41, 6  ;;  %v462_v47 = vrot.slane %v417_v41, 7  ;;  %v475_v48 = vpack.c.bf16 %v417_v41, %v414_v37 }
 0x105   : > { %1378 = vmatmul.mubr.bf16.vlgmr.msra.gmra.mxu0 %v475_v48  ;;  %v464_v49 = vsel %vm463_vm6, %v461_v45, %v462_v47  ;;  %v465_v50 = vsel %vm463_vm6, %v462_v47, %v461_v45  ;;  %v450_v51 = vsel %vm449_vm8, %v447_v42, %v448_v46  ;;  %v451_v52 = vsel %vm449_vm8, %v448_v46, %v447_v42  ;;  %v1252_v48 = vld [vmem:[%s1925_s6] ss:$0 sm:$0xff] }
 0x106   : > { %v1247_v53 = vpack.c.bf16 %v464_v49, %v465_v50  ;;  %v1250_v55 = vpack.c.bf16 %v450_v51, %v451_v52  ;;  %1382 = vmatpush3.bf16.msra.mxu0 %v1492_v44  ;;  %1397 = vmatprep.mubr.msk.bf16.mxu0 %vm1647_vm0, %v1646_v0 }
 0x107   : > { %1383 = vmatprep.subr.bf16.mxu0 %v1646_v0 }
 0x108   : > { %1248 = vmatprep.mubr.msk.bf16.mxu1 %vm1246_vm10, %v1247_v53 }
 0x109   : > { %1251 = vmatmul.mubr.msk.bf16.vlgmr.msra.gmra.mxu1 %vm1834_vm11, %v1250_v55 }
 0x10a   : > { %1325 = vmatpush3.bf16.msra.mxu1 %v1494_v56  ;;  %1384 = vmatpush3.bf16.msra.mxu0 %v1495_v57 }
 0x10b   : > { %1326 = vmatprep.subr.bf16.mxu1 %v1496_v58  ;;  %1385 = vmatprep.subr.bf16.mxu0 %v1646_v0 }
 0x10e   : > { %1327 = vmatpush3.bf16.msra.mxu1 %v1497_v59  ;;  %1386 = vmatpush3.bf16.msra.mxu0 %v1498_v60 }
 0x10f   : > { %1387 = vmatprep.subr.bf16.mxu0 %v1646_v0  ;;  %1328 = vmatprep.subr.bf16.mxu1 %v1499_v61 }
 0x112   : > { %1329 = vmatpush3.bf16.msra.mxu1 %v1500_v62  ;;  %1388 = vmatpush3.bf16.msra.mxu0 %v1501_v63 }
 0x113   : > { %1389 = vmatprep.subr.bf16.mxu0 %v1646_v0  ;;  %1330 = vmatprep.subr.bf16.mxu1 %v1502_v1 }
 0x116   : > { %1331 = vmatpush3.bf16.msra.mxu1 %v1503_v2  ;;  %1390 = vmatpush3.bf16.msra.mxu0 %v1504_v3 }
 0x117   : > { %1391 = vmatprep.subr.bf16.mxu0 %v1646_v0  ;;  %1332 = vmatprep.subr.bf16.mxu1 %v1505_v4 }
 0x11a   : > { %1333 = vmatpush3.bf16.msra.mxu1 %v1506_v5  ;;  %1392 = vmatpush3.bf16.msra.mxu0 %v1507_v6 }
 0x11b   : > { %1393 = vmatprep.subr.bf16.mxu0 %v1646_v0  ;;  %1334 = vmatprep.subr.bf16.mxu1 %v1508_v7 }
 0x11e   : > { %1335 = vmatpush3.bf16.msra.mxu1 %v1509_v8  ;;  %1394 = vmatpush3.bf16.msra.mxu0 %v1510_v9 }
 0x11f   : > { %1395 = vmatprep.subr.bf16.mxu0 %v1646_v0  ;;  %1336 = vmatprep.subr.bf16.mxu1 %v1511_v10 }
 0x122   : > { %1337 = vmatpush3.bf16.msra.mxu1 %v1512_v11  ;;  %1396 = vmatpush3.bf16.msra.mxu0 %v1513_v12 }
 0x123   : > { %1338 = vmatprep.subr.bf16.mxu1 %v1514_v13 }
 0x126   : > { %1339 = vmatpush3.bf16.msra.mxu1 %v1515_v14  ;;  %v1283_v14 = vld [vmem:[%s1926_s7] ss:$0 sm:$0xff] }
 0x1c5   : > { %v750_v15 = vpop.f32.mrf.mxu0 }
 0x1c7   : > { %v1379_v16 = vpop.f32.mrf.mxu0 }
 0x1c8   : > { %v1284_v16 = vld [vmem:[%s1927_s8] ss:$0 sm:$0xff] }
 0x1c9   : > { %v1309_v17 = vpop.f32.mrf.mxu1  ;;  %v753_v18 = vpop.f32.mrf.mxu0 }
 0x1cb   : > { %v1310_v20 = vpop.f32.mrf.mxu1  ;;  %v1380_v21 = vpop.f32.mrf.mxu0 }
 0x1cc   : > { %v1311_v0 = vadd.f32 %v1310_v20, %v1309_v17 }
 0x1cd   : > { %v1312_v22 = vpop.f32.mrf.mxu1 }
 0x1ce   : > { %v710_v23 = vadd.f32 %v1311_v0, %v1221_v19 }
 0x1cf   : > { %v1313_v24 = vpop.f32.mrf.mxu1 }
 0x1d0   : > { %v751_v25 = vadd.f32 %v750_v15, %v710_v23  ;;  %v1314_v26 = vadd.f32 %v1313_v24, %v1312_v22 }
 0x1d2   : > { %v713_v27 = vadd.f32 %v1314_v26, %v1221_v19  ;;  %v757_v28 = vmax.f32 %v751_v25, 0.0 }
 0x1d4   : > { %v754_v30 = vadd.f32 %v753_v18, %v713_v27  ;;  %v759_v32 = vrot.slane %v757_v28, 4  ;;  %v773_v34 = vrot.slane %v757_v28, 6 }
 0x1d6   : > { %v758_v31 = vmax.f32 %v754_v30, 0.0 }
 0x1d8   : > { %v760_v35 = vrot.slane %v758_v31, 4  ;;  %v774_v36 = vrot.slane %v758_v31, 6  ;;  %v780_v37 = vpack.c.bf16 %v758_v31, %v757_v28 }
 0x1da   : > { %1398 = vmatmul.mubr.bf16.vlgmr.msra.gmra.mxu0 %v780_v37  ;;  %v775_v38 = vsel %vm449_vm8, %v773_v34, %v774_v36  ;;  %v776_v39 = vsel %vm449_vm8, %v774_v36, %v773_v34  ;;  %v762_v40 = vsel %vm761_vm12, %v759_v32, %v760_v35  ;;  %v763_v41 = vsel %vm761_vm12, %v760_v35, %v759_v32 }
 0x1db   : > { %v1278_v42 = vpack.c.bf16 %v775_v38, %v776_v39  ;;  %v1281_v43 = vpack.c.bf16 %v762_v40, %v763_v41 }
 0x1dd   : > { %1279 = vmatprep.mubr.msk.bf16.mxu1 %vm1834_vm11, %v1278_v42 }
 0x1de   : > { %1282 = vmatmul.mubr.msk.bf16.vlgmr.msra.gmra.mxu1 %vm1816_vm5, %v1281_v43 }
 0x29a   : > { %v1055_v44 = vpop.f32.mrf.mxu0 }
 0x29c   : > { %v1399_v45 = vpop.f32.mrf.mxu0 }
 0x29e   : > { %v1340_v46 = vpop.f32.mrf.mxu1  ;;  %v1058_v47 = vpop.f32.mrf.mxu0 }
 0x2a0   : > { %v1341_v29 = vpop.f32.mrf.mxu1  ;;  %v1400_v49 = vpop.f32.mrf.mxu0 }
 0x2a1   : > { %v1342_v50 = vadd.f32 %v1341_v29, %v1340_v46 }
 0x2a2   : > { %v1343_v51 = vpop.f32.mrf.mxu1 }
 0x2a3   : > { %v1015_v52 = vadd.f32 %v1342_v50, %v1252_v48 }
 0x2a4   : > { %v1344_v53 = vpop.f32.mrf.mxu1 }
 0x2a5   : > { %v1345_v55 = vadd.f32 %v1344_v53, %v1343_v51  ;;  %v1056_v54 = vadd.f32 %v1055_v44, %v1015_v52 }
 0x2a7   : > { %v1018_v56 = vadd.f32 %v1345_v55, %v1252_v48  ;;  %v1062_v57 = vmax.f32 %v1056_v54, 0.0 }
 0x2a9   : > { %1064 = vadd.xlane.f32.xlu0 %v1062_v57  ;;  %v1070_v33 = vmul.f32 %v1062_v57, %v1062_v57  ;;  %v1059_v58 = vadd.f32 %v1058_v47, %v1018_v56 }
 0x2ab   : > { %1072 = vadd.xlane.f32.xlu1 %v1070_v33  ;;  %v1063_v59 = vmax.f32 %v1059_v58, 0.0 }
 0x2ad   : > { %1066 = vadd.xlane.f32.xlu0 %v1063_v59  ;;  %v1071_v60 = vmul.f32 %v1063_v59, %v1063_v59 }
 0x2af   : > { %1074 = vadd.xlane.f32.xlu1 %v1071_v60 }
 0x332   : > { %v1065_v61 = vpop.xlane.xlu0 %1064 }
 0x333   : > { %v1068_v62 = vmul.f32 0.03125, %v1065_v61 }
 0x334   : > { %v1073_v63 = vpop.xlane.xlu1 %1072 }
 0x335   : > { %v1078_v1 = vmul.f32 %v1068_v62, %v1068_v62  ;;  %v1076_v2 = vmul.f32 0.03125, %v1073_v63  ;;  %v1082_v12 = vsub.f32 %v1062_v57, %v1068_v62 }
 0x336   : > { %v1067_v3 = vpop.xlane.xlu0 %1066 }
 0x337   : > { %v1080_v4 = vsub.f32 %v1076_v2, %v1078_v1  ;;  %v1069_v5 = vmul.f32 0.03125, %v1067_v3 }
 0x338   : > { %v1075_v6 = vpop.xlane.xlu1 %1074 }
 0x339   : > { %v1084_v7 = vadd.f32 1e-05, %v1080_v4  ;;  %v1079_v8 = vmul.f32 %v1069_v5, %v1069_v5  ;;  %v1077_v9 = vmul.f32 0.03125, %v1075_v6  ;;  %v1083_v18 = vsub.f32 %v1063_v59, %v1069_v5 }
 0x33b   : > { %1516 = vrsqrt.f32 %v1084_v7  ;;  %v1081_v10 = vsub.f32 %v1077_v9, %v1079_v8 }
 0x33d   : > { %v1085_v11 = vadd.f32 1e-05, %v1081_v10 }
 0x33f   : > { %1518 = vrsqrt.f32 %v1085_v11 }
 0x348   : > { %v1517_v13 = vpop.eup %1516 }
 0x349   : > { %v1088_v15 = vmul.f32 %v1517_v13, %v1082_v12 }
 0x34b   : > { %v1097_v17 = vmul.f32 %v1283_v14, %v1088_v15 }
 0x34c   : > { %v1519_v19 = vpop.eup %1518 }
 0x34d   : > { %v1106_v20 = vadd.f32 %v1284_v16, %v1097_v17  ;;  %v1089_v21 = vmul.f32 %v1519_v19, %v1083_v18 }
 0x34f   : > { %v1098_v0 = vmul.f32 %v1283_v14, %v1089_v21  ;;  %1109 = vst.msk [vmem:[%s356_s22] sm:$0xff] %vm1108_vm13, %v1106_v20 }
 0x351   : > { %v1107_v22 = vadd.f32 %v1284_v16, %v1098_v0 }
 0x353   : > { %1110 = vst.msk [vmem:[%s356_s22 + $0x8] sm:$0xff] %vm1108_vm13, %v1107_v22 }
 0x354   : > { %1585 = shalt.err (!%p1582_p3)
}
 0x355   : > { %s1586_s26 = scalar_lea.hbm %s1875_s24, 256  ;;  %s1590_s22 = scalar_lea.hbm %s1928_s9, 512 }
 0x356   : > { %p1587_p2 = scmp.ne.s32.totalorder %s1875_s24, %s1586_s26  ;;  %p1591_p7 = scmp.lt.s32.totalorder %s1875_s24, %s1928_s9 }
 0x357   : > { %p1592_p6 = scmp.lt.s32.totalorder %s1590_s22, %s1586_s26 }
 0x358   : > { %p1588_p4 = pnand %p1587_p2, %p1740_p5 }
 0x359   : > { %p1593_p9 = por %p1592_p6, %p1591_p7 }
 0x35a   : > { %p1589_p13 = pneg %p1588_p4 }
 0x35c   : > { %p1594_p10 = pnand %p1593_p9, %p1589_p13 }
 0x35e   : > { %1597 = shalt.err (!%p1594_p10)
}
 0x35f   : > { %s1650_s28 = smov 128   ;;  %s1651_s13 = smov 8  }
 0x360   : > { %1409 = dma.vmem_to_hbm [thread:$0]  (%p1740_p5), %s1877_s25, 256, %s1875_s24, %s1879_s27, %s1650_s28, %s1650_s28, %s1651_s13  }
 0x361 PF: > { %p1426_p12 = scmp.ge.s32.totalorder %s1640_s12, 2  ;;  %s1140_s29 = sand.u32 1, %s1628_s30  }
 0x362   : > { %p1942_p8 = scmp.ne.s32.totalorder %s1931_s20, 0  ;;  %s1141_s14 = scalar_lea.sflag [#allocation4], %s1140_s29 }
 0x364   : > { %p1419_p11 = pnand %p1426_p12, %p1942_p8 }
 0x366   : > { %p1420_p0 = pneg %p1419_p11 }
 0x368   : > { %1623 = dma.done.wait (%p1420_p0), %s1141_s14, 256  }
 0x369   : > { %1625 = vsyncadd (%p1420_p0), %s1141_s14, 4294967040  ;;  %p21_p1 = scmp.ge.s32.totalorder %s1727_s15, 4   ;;  %s1943_s30 = smov %s1632_s10 }
 0x36a   : > { %s1944_s10 = smov %s1636_s11  ;;  %s1945_s11 = smov %s1738_s18 }
 0x36b   : > { %s1946_s12 = smov %s1727_s15  ;;  %23 = sbr.rel (!%p21_p1) target bundleno = 5 (0x5), region = 100 }
 0x370   :  { %1146 = vsyncpa [#allocation3], 1 }
 0x371   :  { %1148 = vsyncpa [#allocation3 + $0x1], 1 }
 0x372   :  { %1149 = vsyncpa [#allocation6], 1 }
 0x373   :  { %1150 = vsyncpa [#allocation4], 1 }
 0x374   :  { %1152 = vsyncpa [#allocation4 + $0x1], 1 }

</bundles_post_ra>
